<compile_context>
chip_gen: v7x
topology: tpu7x:2x2x1
jax: 0.10.0
libtpu: 0.0.40
codegen_flags: <defaults>
</compile_context>

<pallas_src>
import functools

import jax
import jax.numpy as jnp
from jax.experimental import pallas as pl
from jax.experimental.pallas import tpu as pltpu

_MIB = 1024 * 1024


def _rmsnorm_kernel(x_ref, w_ref, o_ref, *, eps, scale_native):
    # x_ref: (block_rows, d_model), w_ref: (1, d_model)
    x = x_ref[...]
    x32 = x.astype(jnp.float32)
    # norm = ||x||_2 / sqrt(d) == sqrt(mean(x^2, -1)); reduction always in f32.
    ms = jnp.mean(x32 * x32, axis=-1, keepdims=True)         # (block_rows, 1)
    # Per-row reciprocal instead of a full-tile divide; exact-divide numerics.
    inv = pl.reciprocal(jnp.sqrt(ms) + eps, approx=False)    # (block_rows, 1)
    if scale_native:
        # bf16 scaling path (v6e/v7x): no full-tile f32 temps on the store path.
        w = w_ref[...].astype(x.dtype)
        o_ref[...] = ((x * inv.astype(x.dtype)) * w).astype(o_ref.dtype)
    else:
        w = w_ref[...].astype(jnp.float32)
        o_ref[...] = (x32 * inv * w).astype(o_ref.dtype)


def _chip_info():
    """Generation-aware VMEM/tiling policy (safe fallbacks if queries fail)."""
    kind = ""
    try:
        kind = jax.devices()[0].device_kind.lower()
    except Exception:
        pass
    vmem_cap = None
    try:
        vmem_cap = int(pltpu.get_tpu_info().vmem_capacity_bytes)
    except Exception:
        vmem_cap = None
    is_v7 = "v7" in kind
    if vmem_cap is None:
        vmem_cap = 64 * _MIB if is_v7 else 128 * _MIB
    if vmem_cap <= 80 * _MIB:
        # v7x-class: 64 MiB physical per TensorCore -> stay well inside it.
        vmem_limit = min(48 * _MIB, (vmem_cap * 3) // 4)
        tile_budget = 18 * _MIB
    else:
        # v5e / v6e (and other 128 MiB-VMEM chips): use most of it.
        vmem_limit = 64 * _MIB
        tile_budget = 26 * _MIB
    num_cores = 2 if is_v7 else 1
    # v5e has no bf16 VALU; keep the full-tile f32 path there.
    is_v5e = ("v5 lite" in kind) or ("v5e" in kind) or ("v5litepod" in kind)
    return {
        "vmem_limit": vmem_limit,
        "tile_budget": tile_budget,
        "num_cores": num_cores,
        "native_bf16_scale": not is_v5e,
    }


def _choose_block_rows(rows, d_model, itemsize, pack, tile_budget_bytes,
                       num_cores, f32_temp_bytes, step_floor_bytes=6 * _MIB):
    """Largest row tile under the VMEM byte budget; no fixed row cap."""
    # double-buffered in + out tiles (native dtype) + in-kernel f32 temporaries
    per_row = d_model * (4 * itemsize + f32_temp_bytes)
    budget_rows = max(tile_budget_bytes // max(per_row, 1), 1)

    # Never shrink a step below ~6 MiB of input read (per-grid-step overhead tax)...
    floor_rows = max(step_floor_bytes // max(d_model * itemsize, 1), 1)

    # ...but aim for >= 2 grid steps per TensorCore when there is enough work,
    # so each core can double-buffer (and both v7x cores get rows).
    target_steps = 2 * num_cores
    steps_rows = -(-rows // target_steps)   # cdiv

    br = min(budget_rows, max(steps_rows, floor_rows))
    if br >= rows:
        return rows                          # single full-extent block (always legal)
    br = max((br // pack) * pack, pack)      # align to sublane packing
    if br >= rows:
        return rows
    return br


def rmsnorm(x, weight, eps: float = 1e-6, block_rows=None):
    """RMSNorm over the last axis. x: (..., d_model), weight: (d_model,)."""
    orig_shape = x.shape
    d_model = orig_shape[-1]
    rows = 1
    for s in orig_shape[:-1]:
        rows *= int(s)
    x2d = x.reshape(rows, d_model)
    w2d = weight.reshape(1, d_model)

    info = _chip_info()
    itemsize = x.dtype.itemsize
    pack = max(32 // itemsize, 8)            # sublane packing: 8/f32, 16/bf16, 32/int8
    scale_native = (x.dtype == jnp.bfloat16) and info["native_bf16_scale"]
    f32_temp_bytes = 4 if scale_native else 8

    if block_rows is None:
        block_rows = _choose_block_rows(rows, d_model, itemsize, pack,
                                        info["tile_budget"], info["num_cores"],
                                        f32_temp_bytes)
    block_rows = min(block_rows, rows)

    # TODO(synk): if production ever runs d_model not 128-aligned, fold rows into
    # the lane axis (or pad d_model) to avoid masked vst partial stores.

    grid = (pl.cdiv(rows, block_rows),)      # ragged last block is masked by Pallas;
                                             # reduction is along d_model so padded
                                             # rows never contaminate valid rows.

    cost = pl.CostEstimate(
        flops=4 * rows * d_model,
        transcendentals=2 * rows,
        bytes_accessed=2 * rows * d_model * itemsize
        + d_model * weight.dtype.itemsize,
    )
    kernel = functools.partial(_rmsnorm_kernel, eps=eps, scale_native=scale_native)
    out_shape = jax.ShapeDtypeStruct((rows, d_model), x.dtype)

    def build(row_semantics, x_buffers):
        x_spec_kwargs = {}
        if x_buffers != 2:
            x_spec_kwargs["pipeline_mode"] = pl.Buffered(x_buffers)
        return pl.pallas_call(
            kernel,
            out_shape=out_shape,
            grid_spec=pltpu.PrefetchScalarGridSpec(
                num_scalar_prefetch=0,
                grid=grid,
                in_specs=[
                    pl.BlockSpec((block_rows, d_model), lambda i: (i, 0),
                                 **x_spec_kwargs),
                    # weight: constant index_map -> fetched once, stays resident.
                    pl.BlockSpec((1, d_model), lambda i: (0, 0)),
                ],
                out_specs=pl.BlockSpec((block_rows, d_model), lambda i: (i, 0)),
            ),
            compiler_params=pltpu.CompilerParams(
                dimension_semantics=(row_semantics,),
                vmem_limit_bytes=info["vmem_limit"],
            ),
            cost_estimate=cost,
        )

    if info["num_cores"] > 1 and grid[0] >= info["num_cores"]:
        # v7x: force the row axis across both TensorCores + 3-deep input pipeline;
        # fall back to the portable path if this lowering is rejected.
        try:
            out = build(pltpu.CORE_PARALLEL, 3)(x2d, w2d)
        except Exception:
            out = build("parallel", 2)(x2d, w2d)
    else:
        out = build("parallel", 2)(x2d, w2d)

    return out.reshape(orig_shape)


def rmsnorm_ref(x, weight, eps: float = 1e-6):
    """Pure-JAX reference matching the PyTorch forward exactly."""
    norm = jnp.linalg.norm(x, axis=-1, keepdims=True) / (x.shape[-1] ** 0.5)
    return weight * x / (norm + eps)


if __name__ == "__main__":
    key = jax.random.PRNGKey(0)
    kx, kw, kx2 = jax.random.split(key, 3)

    batch, seq, d_model = 2, 8, 32
    x = jax.random.normal(kx, (batch, seq, d_model), dtype=jnp.float32)
    # module init is ones(d_model); perturb so the weight multiply is exercised
    weight = jnp.ones((d_model,), jnp.float32) + 0.1 * jax.random.normal(
        kw, (d_model,), jnp.float32
    )

    out = jax.block_until_ready(rmsnorm(x, weight, eps=1e-6))
    ref = rmsnorm_ref(x, weight, eps=1e-6)
    assert out.shape == x.shape
    assert jnp.allclose(out, ref, atol=1e-5, rtol=1e-5), "mismatch vs reference"

    # ragged path: rows (=15) not divisible by a forced 8-row tile -> masked last block
    x2 = jax.random.normal(kx2, (3, 5, d_model), dtype=jnp.float32)
    out2 = jax.block_until_ready(rmsnorm(x2, weight, eps=1e-6, block_rows=8))
    ref2 = rmsnorm_ref(x2, weight, eps=1e-6)
    assert jnp.allclose(out2, ref2, atol=1e-5, rtol=1e-5), "ragged mismatch vs reference"

    print("KERNEL_OK")
</pallas_src>

<mosaic_0001>
module attributes {stable_mosaic.version = 11 : i64} {
  func.func @_rmsnorm_kernel(%arg0: i32, %arg1: memref<16x32xf32, #tpu.memory_space<vmem>>, %arg2: memref<1x32xf32, #tpu.memory_space<vmem>>, %arg3: memref<16x32xf32, #tpu.memory_space<vmem>>) attributes {dimension_semantics = [#tpu.dimension_semantics<parallel>], iteration_bounds = array<i64: 1>, scalar_prefetch = 0 : i64, scratch_operands = 0 : i64, tpu.core_type = #tpu.core_type<tc>, window_params = [{transform_indices = @transform_0, window_bounds = array<i64: 16, 32>}, {pipeline_mode = #tpu.pipeline_mode<synchronous>, transform_indices = @transform_1, window_bounds = array<i64: 1, 32>}, {transform_indices = @transform_2, window_bounds = array<i64: 16, 32>}]} {
    %c0 = arith.constant 0 : index
    %c0_0 = arith.constant 0 : index
    %0 = vector.load %arg1[%c0, %c0_0] : memref<16x32xf32, #tpu.memory_space<vmem>>, vector<16x32xf32>
    %1 = arith.mulf %0, %0 : vector<16x32xf32>
    %cst = arith.constant dense<0.000000e+00> : vector<16xf32>
    %2 = vector.multi_reduction <add>, %1, %cst [1] : vector<16x32xf32> to vector<16xf32>
    %3 = vector.shape_cast %2 : vector<16xf32> to vector<16x1xf32>
    %cst_1 = arith.constant 3.200000e+01 : f32
    %4 = vector.broadcast %cst_1 : f32 to vector<16x1xf32>
    %5 = arith.divf %3, %4 : vector<16x1xf32>
    %6 = math.sqrt %5 : vector<16x1xf32>
    %cst_2 = arith.constant 9.99999997E-7 : f32
    %7 = vector.broadcast %cst_2 : f32 to vector<16x1xf32>
    %8 = arith.addf %6, %7 : vector<16x1xf32>
    %9 = tpu.reciprocal %8 : vector<16x1xf32> -> vector<16x1xf32>
    %c0_3 = arith.constant 0 : index
    %c0_4 = arith.constant 0 : index
    %10 = vector.load %arg2[%c0_3, %c0_4] : memref<1x32xf32, #tpu.memory_space<vmem>>, vector<1x32xf32>
    %11 = vector.broadcast %9 : vector<16x1xf32> to vector<16x32xf32>
    %12 = arith.mulf %0, %11 : vector<16x32xf32>
    %13 = vector.broadcast %10 : vector<1x32xf32> to vector<16x32xf32>
    %14 = arith.mulf %12, %13 : vector<16x32xf32>
    %c0_5 = arith.constant 0 : index
    %c0_6 = arith.constant 0 : index
    %15 = vector.load %arg3[%c0_5, %c0_6] : memref<16x32xf32, #tpu.memory_space<vmem>>, vector<16x32xf32>
    tpu.vector_store %arg3[%c0_5, %c0_6], %14 {strides = array<i32>} : memref<16x32xf32, #tpu.memory_space<vmem>>, vector<16x32xf32>,
    return
  }
  func.func @transform_0(%arg0: i32) -> (i32, i32) {
    %c0_i32 = arith.constant 0 : i32
    %c0_i32_0 = arith.constant 0 : i32
    return %arg0, %c0_i32 : i32, i32
  }
  func.func @transform_1(%arg0: i32) -> (i32, i32) {
    %c0_i32 = arith.constant 0 : i32
    %c0_i32_0 = arith.constant 0 : i32
    %c0_i32_1 = arith.constant 0 : i32
    return %c0_i32, %c0_i32_0 : i32, i32
  }
  func.func @transform_2(%arg0: i32) -> (i32, i32) {
    %c0_i32 = arith.constant 0 : i32
    %c0_i32_0 = arith.constant 0 : i32
    return %arg0, %c0_i32 : i32, i32
  }
}

</mosaic_0001>

<bundles_post_ra>
// kernel: tpu_custom_call.1
= control target key start
LH: loop header
LB: loop body
LE: loop exit
PB: predicated region body
PF: predicated region fallthrough
CT: control target
= control target key end

     0   :  { %7 = vsyncpa [#allocation3], 0  ;;  %s253_s0 = inlined_call_operand.hbm [shape: f32[16,32], index: 0, kind: input, shape index: {}]   ;;  %s254_s1 = inlined_call_operand.hbm [shape: f32[1,32], index: 1, kind: input, shape index: {}]   ;;  %s255_s2 = inlined_call_operand.hbm [shape: f32[16,32], index: 2, kind: output, shape index: {}]  }
   0x1   :  { %8 = vsyncpa [#allocation6], 0 }
   0x2   :  { %9 = vsyncpa [#allocation4], 0  ;;  %s187_s9 = smov [#allocation2]   ;;  %s115_s13 = scalar_lea.hbm %s253_s0, 256 }
   0x3   :  { %s15_s10 = sshll.u32 %s187_s9, 4  ;;  %p116_p0 = scmp.ne.s32.totalorder %s253_s0, %s115_s13  ;;  %s16_s10 = int_to_ptr.vmem [resolvable:$true] %s15_s10 }
   0x4   :  { %p119_p1 = scmp.lt.u32.totalorder %s115_s13, %s253_s0 }
   0x6   :  { %p121_p2 = pnand %p119_p1, %p116_p0 }
   0x8   :  { %124 = shalt.err (!%p121_p2)
}
   0x9   :  { %s125_s18 = scalar_lea.vmem %s16_s10, 256  ;;  %p130_p4 = scmp.lt.s32.totalorder %s16_s10, %s16_s10 }
   0xa   :  { %p126_p3 = scmp.ne.s32.totalorder %s16_s10, %s125_s18  ;;  %p131_p5 = scmp.lt.s32.totalorder %s125_s18, %s125_s18 }
   0xc   :  { %p132_p6 = por %p131_p5, %p130_p4 }
   0xe   :  { %p133_p7 = pnand %p132_p6, %p126_p3 }
  0x10   :  { %136 = shalt.err (!%p133_p7)
}
  0x11   :  { %s188_s19 = smov 128   ;;  %s189_s20 = smov 8  }
  0x12   :  { %21 = dma.hbm_to_vmem [thread:$0]  %s253_s0, 256, %s16_s10, [#allocation3], %s188_s19, %s188_s19, %s189_s20  }
  0x13   :  { %s190_s23 = smov [#allocation5]   ;;  %s137_s27 = scalar_lea.hbm %s254_s1, 16 }
  0x14   :  { %s28_s24 = sshll.u32 %s190_s23, 4  ;;  %p138_p8 = scmp.ne.s32.totalorder %s254_s1, %s137_s27  ;;  %s29_s24 = int_to_ptr.vmem [resolvable:$true] %s28_s24 }
  0x15   :  { %p141_p9 = scmp.lt.u32.totalorder %s137_s27, %s254_s1 }
  0x17   :  { %p143_p10 = pnand %p141_p9, %p138_p8 }
  0x19   :  { %146 = shalt.err (!%p143_p10)
}
  0x1a   :  { %s147_s4 = scalar_lea.vmem %s29_s24, 16  ;;  %s151_s0 = scalar_lea.vmem %s29_s24, 32 }
  0x1b   :  { %p148_p11 = scmp.ne.s32.totalorder %s29_s24, %s147_s4  ;;  %p152_p12 = scmp.lt.s32.totalorder %s29_s24, %s29_s24 }
  0x1c   :  { %p153_p13 = scmp.lt.s32.totalorder %s151_s0, %s147_s4 }
  0x1e   :  { %p154_p0 = por %p153_p13, %p152_p12 }
  0x20   :  { %p155_p1 = pnand %p154_p0, %p148_p11 }
  0x22   :  { %158 = shalt.err (!%p155_p1)
}
  0x23   :  { %31 = dma.hbm_to_vmem [thread:$0]  %s254_s1, 16, %s29_s24, [#allocation6]  }
  0x24   :  { %181 = dma.done.wait [#allocation3], 256  }
  0x25   :  { %182 = vsyncadd [#allocation3], 4294967040 }
  0x26   :  { %183 = dma.done.wait [#allocation6], 16  }
  0x27   :  { %184 = vsyncadd [#allocation6], 4294967280  ;;  %v38_v0 = vld [vmem:[#allocation2] sm:$0xff]  ;;  %vm42_vm0 = vcmask 261120   ;;  %v39_v1 = vld [vmem:[#allocation2 + $0x8] sm:$0xff]  ;;  %s191_s1 = smov [#allocation7]  }
  0x28   :  { %v40_v2 = vmul.f32 %v38_v0, %v38_v0  ;;  %v41_v3 = vmul.f32 %v39_v1, %v39_v1  ;;  %v101_v23 = vld [vmem:[#allocation5] ss:$0 sm:$0xff]  ;;  %s88_s7 = sshll.u32 %s191_s1, 4  ;;  %s89_s7 = int_to_ptr.vmem [resolvable:$true] %s88_s7 }
  0x29   :  { %s159_s8 = scalar_lea.vmem %s89_s7, 256  ;;  %p164_p3 = scmp.lt.s32.totalorder %s89_s7, %s89_s7 }
  0x2a   :  { %v43_v4 = vsel %vm42_vm0, %v40_v2, 0.0  ;;  %v46_v5 = vsel %vm42_vm0, %v41_v3, 0.0  ;;  %p160_p2 = scmp.ne.s32.totalorder %s89_s7, %s159_s8  ;;  %p165_p4 = scmp.lt.s32.totalorder %s159_s8, %s159_s8 }
  0x2b   :  { %44 = vadd.xlane.f32.xlu0 %v43_v4 }
  0x2c   :  { %p166_p5 = por %p165_p4, %p164_p3 }
  0x2e   :  { %p167_p6 = pnand %p166_p5, %p160_p2 }
  0x2f   :  { %47 = vadd.xlane.f32.xlu0 %v46_v5 }
  0xb8   :  { %v45_v6 = vpop.xlane.xlu0 %44 }
  0xb9   :  { %v50_v7 = vmul.f32 0.03125, %v45_v6 }
  0xbb   :  { %107 = vrsqrt.f32 %v50_v7  ;;  %vm54_vm1 = vcmp.eq.f32.partialorder %v50_v7, inf  ;;  %v57_v12 = vand.u32 2147483648, %v50_v7  ;;  %vm56_vm2 = vcmp.eq.f32.partialorder %v50_v7, 0.0 }
  0xbc   :  { %v48_v8 = vpop.xlane.xlu0 %47 }
  0xbd   :  { %v51_v9 = vmul.f32 0.03125, %v48_v8 }
  0xbf   :  { %109 = vrsqrt.f32 %v51_v9  ;;  %vm61_vm3 = vcmp.eq.f32.partialorder %v51_v9, inf  ;;  %v64_v18 = vand.u32 2147483648, %v51_v9  ;;  %vm63_vm4 = vcmp.eq.f32.partialorder %v51_v9, 0.0 }
  0xc5   :  { %v108_v10 = vpop.eup %107 }
  0xc6   :  { %v53_v11 = vmul.f32 %v108_v10, %v50_v7 }
  0xc8   :  { %v55_v13 = vsel %vm54_vm1, %v50_v7, %v53_v11 }
  0xc9   :  { %v110_v14 = vpop.eup %109  ;;  %v58_v15 = vsel %vm56_vm2, %v57_v12, %v55_v13 }
  0xca   :  { %v66_v16 = vadd.f32 1e-06, %v58_v15  ;;  %v60_v17 = vmul.f32 %v110_v14, %v51_v9 }
  0xcc   :  { %v62_v19 = vsel %vm61_vm3, %v51_v9, %v60_v17  ;;  %111 = vrcp.f32 %v66_v16 }
  0xcd   :  { %v65_v20 = vsel %vm63_vm4, %v64_v18, %v62_v19 }
  0xce   :  { %v67_v21 = vadd.f32 1e-06, %v65_v20 }
  0xd0   :  { %113 = vrcp.f32 %v67_v21 }
  0xd6   :  { %v112_v22 = vpop.eup %111 }
  0xd7   :  { %v71_v24 = vmul.f32 %v112_v22, %v38_v0 }
  0xd9   :  { %v79_v25 = vmul.f32 %v101_v23, %v71_v24 }
  0xda   :  { %v114_v26 = vpop.eup %113 }
  0xdb   :  { %v72_v27 = vmul.f32 %v114_v26, %v39_v1  ;;  %81 = vst.msk [vmem:[#allocation7] sm:$0xff] %vm42_vm0, %v79_v25 }
  0xdd   :  { %v80_v28 = vmul.f32 %v101_v23, %v72_v27 }
  0xdf   :  { %82 = vst.msk [vmem:[#allocation7 + $0x8] sm:$0xff] %vm42_vm0, %v80_v28 }
  0xe0   :  { %170 = shalt.err (!%p167_p6)
}
  0xe1   :  { %s171_s11 = scalar_lea.hbm %s255_s2, 256 }
  0xe2   :  { %p172_p7 = scmp.ne.s32.totalorder %s255_s2, %s171_s11  ;;  %p175_p8 = scmp.lt.u32.totalorder %s171_s11, %s255_s2 }
  0xe4   :  { %p177_p9 = pnand %p175_p8, %p172_p7 }
  0xe6   :  { %180 = shalt.err (!%p177_p9)
}
  0xe7   :  { %94 = dma.vmem_to_hbm [thread:$0]  %s89_s7, 256, %s255_s2, [#allocation4], %s188_s19, %s188_s19, %s189_s20  }
  0xe8   :  { %185 = dma.done.wait [#allocation4], 256  }
  0xe9   :  { %186 = vsyncadd [#allocation4], 4294967040 }
  0xea   :  { %98 = vsyncpa [#allocation3], 1 }
  0xeb   :  { %99 = vsyncpa [#allocation6], 1 }
  0xec   :  { %100 = vsyncpa [#allocation4], 1 }

</bundles_post_ra>
